<compile_context>
chip_gen: v5e
topology: v5e:2x2
jax: 0.10.0
libtpu: 0.0.40
codegen_flags: <defaults>
</compile_context>

<pallas_src>
import jax
import jax.numpy as jnp
import numpy as np
from jax.experimental import pallas as pl
from jax.experimental.pallas import tpu as pltpu

dense_sampling_L = 20
num_of_adc_p = 4
num_samples_L_tilde = 4


def _hard_sampling_indices(weight):
    """__init__ round/clamp + forward index computation (exact PyTorch formula)."""
    rounded = jnp.clip(jnp.round(weight), 1, dense_sampling_L).astype(jnp.int32)
    i = jnp.arange(num_of_adc_p, dtype=jnp.int32)[:, None]        # (4, 1)
    j = rounded[:num_samples_L_tilde][None, :]                     # (1, 4)
    return (i * dense_sampling_L + j).reshape(-1)                  # (16,)


def _selection_matrix(idx, in_features, out_features, dtype):
    """One-hot (in_features, out_features) matrix: S[idx[k], k] = 1."""
    rows = jax.lax.broadcasted_iota(jnp.int32, (in_features, out_features), 0)
    return (rows == idx[None, :]).astype(dtype)


def _sampling_kernel(x_ref, sel_ref, o_ref):
    # Gather-as-matmul on the MXU; f32 accumulation keeps the gather bit-exact
    # for f32/bf16 inputs.  DMA of x is the binding resource, so no further
    # compute tuning is useful here.
    o_ref[...] = jnp.dot(x_ref[...], sel_ref[...],
                         preferred_element_type=jnp.float32)


def hard_sampling_layer(x, weight, *, block_rows=2048):
    """x: (N, num_of_adc_p * dense_sampling_L) -> (N, 16) float32."""
    n, f = x.shape
    assert f == num_of_adc_p * dense_sampling_L
    out_f = num_of_adc_p * num_samples_L_tilde

    idx = _hard_sampling_indices(weight)
    # Build S in x's dtype (bf16 input -> bf16 HBM read traffic); accumulate f32.
    sel = _selection_matrix(idx, f, out_f, x.dtype)

    # Row tile: multiple of 8 (f32 sublane alignment), capped by N.  Large tiles
    # amortize per-grid-step overhead; VMEM use stays tiny (2048*80*4 = 640 KiB
    # per x buffer).  Pallas masks a partial last tile if N % tm != 0.
    tm = min(block_rows, n)
    tm = max(8, ((tm + 7) // 8) * 8)
    grid = (pl.cdiv(n, tm),)

    itemsize = jnp.dtype(x.dtype).itemsize
    cost = pl.CostEstimate(
        flops=2 * n * f * out_f,
        transcendentals=0,
        bytes_accessed=n * f * itemsize + f * out_f * itemsize + n * out_f * 4,
    )

    return pl.pallas_call(
        _sampling_kernel,
        out_shape=jax.ShapeDtypeStruct((n, out_f), jnp.float32),
        grid=grid,
        in_specs=[
            pl.BlockSpec((tm, f), lambda i: (i, 0)),      # pipelined row tile of x
            pl.BlockSpec((f, out_f), lambda i: (0, 0)),   # selection matrix stays resident
        ],
        out_specs=pl.BlockSpec((tm, out_f), lambda i: (i, 0)),
        compiler_params=pltpu.CompilerParams(
            dimension_semantics=("parallel",)),            # megacore sharding on v7x
        cost_estimate=cost,
    )(x, sel)


if __name__ == "__main__":
    key = jax.random.PRNGKey(0)
    k_x, _ = jax.random.split(key)

    n = 512                                   # small batch, multiple row tiles
    f = num_of_adc_p * dense_sampling_L       # 80

    x = jax.random.normal(k_x, (n, f), dtype=jnp.float32)
    # Deterministic weights: exercise rounding and the lower clamp (0.2 -> 1).
    # (A weight clamping to 20 would be out of bounds in PyTorch too; see NOTE.)
    weight = jnp.array([2.3, 5.7, 0.2, 19.4], dtype=jnp.float32)

    out = jax.block_until_ready(
        hard_sampling_layer(x, weight, block_rows=128))    # grid of 4 row tiles

    # Reference: plain JAX gather mirroring the PyTorch loops.
    idx = _hard_sampling_indices(weight)
    ref = x[:, idx]

    np.testing.assert_allclose(np.asarray(out), np.asarray(ref),
                               rtol=1e-6, atol=1e-6)
    print("KERNEL_OK")
</pallas_src>

<mosaic_0001>
module attributes {stable_mosaic.version = 11 : i64} {
  func.func @_sampling_kernel(%arg0: i32, %arg1: memref<128x80xf32, #tpu.memory_space<vmem>>, %arg2: memref<80x16xf32, #tpu.memory_space<vmem>>, %arg3: memref<128x16xf32, #tpu.memory_space<vmem>>) attributes {dimension_semantics = [#tpu.dimension_semantics<parallel>], iteration_bounds = array<i64: 4>, scalar_prefetch = 0 : i64, scratch_operands = 0 : i64, tpu.core_type = #tpu.core_type<tc>, window_params = [{transform_indices = @transform_0, window_bounds = array<i64: 128, 80>}, {pipeline_mode = #tpu.pipeline_mode<synchronous>, transform_indices = @transform_1, window_bounds = array<i64: 80, 16>}, {transform_indices = @transform_2, window_bounds = array<i64: 128, 16>}]} {
    %c0 = arith.constant 0 : index
    %c0_0 = arith.constant 0 : index
    %0 = vector.load %arg1[%c0, %c0_0] : memref<128x80xf32, #tpu.memory_space<vmem>>, vector<128x80xf32>
    %c0_1 = arith.constant 0 : index
    %c0_2 = arith.constant 0 : index
    %1 = vector.load %arg2[%c0_1, %c0_2] : memref<80x16xf32, #tpu.memory_space<vmem>>, vector<80x16xf32>
    %cst = arith.constant dense<0.000000e+00> : vector<128x16xf32>
    %2 = tpu.matmul %0, %1, %cst {dimension_numbers = #tpu.dot_dimension_numbers<[1], [0], [0], [1], [0, 0, 1, 1], [], []>} : vector<128x80xf32>, vector<80x16xf32>, vector<128x16xf32> -> vector<128x16xf32>
    %c0_3 = arith.constant 0 : index
    %c0_4 = arith.constant 0 : index
    %3 = vector.load %arg3[%c0_3, %c0_4] : memref<128x16xf32, #tpu.memory_space<vmem>>, vector<128x16xf32>
    tpu.vector_store %arg3[%c0_3, %c0_4], %2 {strides = array<i32>} : memref<128x16xf32, #tpu.memory_space<vmem>>, vector<128x16xf32>,
    return
  }
  func.func @transform_0(%arg0: i32) -> (i32, i32) {
    %c0_i32 = arith.constant 0 : i32
    %c0_i32_0 = arith.constant 0 : i32
    return %arg0, %c0_i32 : i32, i32
  }
  func.func @transform_1(%arg0: i32) -> (i32, i32) {
    %c0_i32 = arith.constant 0 : i32
    %c0_i32_0 = arith.constant 0 : i32
    %c0_i32_1 = arith.constant 0 : i32
    return %c0_i32, %c0_i32_0 : i32, i32
  }
  func.func @transform_2(%arg0: i32) -> (i32, i32) {
    %c0_i32 = arith.constant 0 : i32
    %c0_i32_0 = arith.constant 0 : i32
    return %arg0, %c0_i32 : i32, i32
  }
}

</mosaic_0001>

<bundles_post_ra>
// kernel: tpu_custom_call.1
= control target key start
LH: loop header
LB: loop body
LE: loop exit
PB: predicated region body
PF: predicated region fallthrough
CT: control target
= control target key end

     0   :  { %s448_s9 = smov 0   ;;  %s570_s0 = inlined_call_operand.vmem [shape: f32[512,80], index: 0, kind: input, shape index: {}]   ;;  %s571_s1 = inlined_call_operand.vmem [shape: f32[80,16], index: 1, kind: input, shape index: {}]   ;;  %s572_s2 = inlined_call_operand.vmem [shape: f32[512,16], index: 2, kind: output, shape index: {}]  }
   0x1 LB: > { %s360_s10 = sadd.s32 4294967295, %s431_s9   ;;  %p364_p0 = scmp.ge.s32.totalorder %s431_s9, 1  ;;  %s431_s9 = sphi %s448_s9, %s12_s9  }
   0x2   : > { %p113_p1 = scmp.lt.s32.totalorder %s431_s9, 5 }
   0x4   : > { %p114_p2 = pnand %p364_p0, %p113_p1 }
   0x5   : > { %s365_s15 = sshll.u32 (!%p114_p2), %s360_s10, 4 }
   0x6   : > { %117 = sbr.rel (%p114_p2) target bundleno = 189 (0xbd), region = 28  ;;  %p136_p3 = scmp.lt.s32.totalorder (!%p114_p2), %s365_s15, 63 }
   0xb   : > { %v172_v0 = vld [vmem:[%s571_s1 + $0x48] sm:$0xff]  ;;  %v171_v1 = vld [vmem:[%s571_s1 + $0x40] sm:$0xff]  ;;  %v170_v2 = vld [vmem:[%s571_s1 + $0x38] sm:$0xff]  ;;  %s574_s15 = smov (!%p136_p3, %s365_s15), 63  ;;  %vm173_vm0 = vcmask 654336   ;;  %vm287_vm1 = vcmask 130048  }
   0xc   : > { %388 = vmatpush.msra.mxu2 %v172_v0  ;;  %389 = vmatpush.msra.mxu3 %v172_v0  ;;  %v169_v3 = vld [vmem:[%s571_s1 + $0x30] sm:$0xff]  ;;  %v168_v4 = vld [vmem:[%s571_s1 + $0x28] sm:$0xff]  ;;  %v167_v5 = vld [vmem:[%s571_s1 + $0x20] sm:$0xff]  ;;  %s366_s26 = sshll.u32 %s574_s15, 3 }
   0xd   : > { %228 = vmatpush.msra.mxu0 %v172_v0  ;;  %387 = vmatpush.msra.mxu1 %v172_v0  ;;  %v166_v6 = vld [vmem:[%s571_s1 + $0x18] sm:$0xff]  ;;  %v165_v7 = vld [vmem:[%s571_s1 + $0x10] sm:$0xff]  ;;  %v164_v8 = vld [vmem:[%s571_s1 + $0x8] sm:$0xff]  ;;  %s491_s5 = scalar_lea.vmem %s570_s0, %s366_s26  ;;  %s533_s11 = scalar_lea.vmem %s572_s2, %s366_s26 }
   0xe   : > { %391 = vmatpush.msra.mxu2 %v171_v1  ;;  %392 = vmatpush.msra.mxu3 %v171_v1  ;;  %v163_v9 = vld [vmem:[%s571_s1] sm:$0xff]  ;;  %v156_v14 = vld [vmem:[%s491_s5 + $0x48] sm:$0xff]  ;;  %v157_v18 = vld [vmem:[%s491_s5 + $0x50] sm:$0xff] }
   0xf   : > { %229 = vmatpush.msra.mxu0 %v171_v1  ;;  %390 = vmatpush.msra.mxu1 %v171_v1  ;;  %v155_v10 = vld [vmem:[%s491_s5 + $0x40] sm:$0xff]  ;;  %v160_v15 = vld [vmem:[%s491_s5 + $0x68] sm:$0xff]  ;;  %v161_v19 = vld [vmem:[%s491_s5 + $0x70] sm:$0xff] }
  0x10   : > { %394 = vmatpush.msra.mxu2 %v170_v2  ;;  %395 = vmatpush.msra.mxu3 %v170_v2  ;;  %v159_v11 = vld [vmem:[%s491_s5 + $0x60] sm:$0xff]  ;;  %v148_v16 = vld [vmem:[%s491_s5 + $0x8] sm:$0xff]  ;;  %v149_v20 = vld [vmem:[%s491_s5 + $0x10] sm:$0xff] }
  0x11   : > { %230 = vmatpush.msra.mxu0 %v170_v2  ;;  %393 = vmatpush.msra.mxu1 %v170_v2  ;;  %v147_v12 = vld [vmem:[%s491_s5] sm:$0xff]  ;;  %v152_v17 = vld [vmem:[%s491_s5 + $0x28] sm:$0xff]  ;;  %v153_v21 = vld [vmem:[%s491_s5 + $0x30] sm:$0xff] }
  0x12   : > { %397 = vmatpush.msra.mxu2 %v169_v3  ;;  %398 = vmatpush.msra.mxu3 %v169_v3  ;;  %v151_v13 = vld [vmem:[%s491_s5 + $0x20] sm:$0xff]  ;;  %v158_v22 = vld [vmem:[%s491_s5 + $0x58] sm:$0xff] }
  0x13   : > { %231 = vmatpush.msra.mxu0 %v169_v3  ;;  %396 = vmatpush.msra.mxu1 %v169_v3  ;;  %v162_v23 = vld [vmem:[%s491_s5 + $0x78] sm:$0xff] }
  0x14   : > { %400 = vmatpush.msra.mxu2 %v168_v4  ;;  %401 = vmatpush.msra.mxu3 %v168_v4  ;;  %v150_v24 = vld [vmem:[%s491_s5 + $0x18] sm:$0xff] }
  0x15   : > { %232 = vmatpush.msra.mxu0 %v168_v4  ;;  %399 = vmatpush.msra.mxu1 %v168_v4  ;;  %v154_v25 = vld [vmem:[%s491_s5 + $0x38] sm:$0xff] }
  0x16   : > { %403 = vmatpush.msra.mxu2 %v167_v5  ;;  %404 = vmatpush.msra.mxu3 %v167_v5 }
  0x17   : > { %233 = vmatpush.msra.mxu0 %v167_v5  ;;  %402 = vmatpush.msra.mxu1 %v167_v5 }
  0x18   : > { %406 = vmatpush.msra.mxu2 %v166_v6  ;;  %407 = vmatpush.msra.mxu3 %v166_v6 }
  0x19   : > { %234 = vmatpush.msra.mxu0 %v166_v6  ;;  %405 = vmatpush.msra.mxu1 %v166_v6 }
  0x1a   : > { %409 = vmatpush.msra.mxu2 %v165_v7  ;;  %410 = vmatpush.msra.mxu3 %v165_v7 }
  0x1b   : > { %235 = vmatpush.msra.mxu0 %v165_v7  ;;  %408 = vmatpush.msra.mxu1 %v165_v7 }
  0x1c   : > { %412 = vmatpush.msra.mxu2 %v164_v8  ;;  %413 = vmatpush.msra.mxu3 %v164_v8 }
  0x1d   : > { %236 = vmatpush.msra.mxu0 %v164_v8  ;;  %411 = vmatpush.msra.mxu1 %v164_v8 }
  0x1e   : > { %415 = vmatpush.msra.mxu2 %v163_v9  ;;  %416 = vmatpush.msra.mxu3 %v163_v9 }
  0x1f   : > { %377 = vmatmul.msk.f32.vlgmr.msra.gmra.mxu2 %vm173_vm0, %v155_v10  ;;  %381 = vmatmul.msk.f32.vlgmr.msra.gmra.mxu3 %vm173_vm0, %v159_v11 }
  0x20   : > { %237 = vmatpush.msra.mxu0 %v163_v9  ;;  %414 = vmatpush.msra.mxu1 %v163_v9 }
  0x21   : > { %369 = vmatmul.msk.f32.vlgmr.msra.gmra.mxu0 %vm173_vm0, %v147_v12  ;;  %373 = vmatmul.msk.f32.vlgmr.msra.gmra.mxu1 %vm173_vm0, %v151_v13 }
  0x27   : > { %378 = vmatmul.msk.f32.gmra.mxu2 %vm173_vm0, %v156_v14  ;;  %382 = vmatmul.msk.f32.gmra.mxu3 %vm173_vm0, %v160_v15 }
  0x29   : > { %370 = vmatmul.msk.f32.gmra.mxu0 %vm173_vm0, %v148_v16  ;;  %374 = vmatmul.msk.f32.gmra.mxu1 %vm173_vm0, %v152_v17 }
  0x2f   : > { %379 = vmatmul.msk.f32.gmra.mxu2 %vm173_vm0, %v157_v18  ;;  %383 = vmatmul.msk.f32.gmra.mxu3 %vm173_vm0, %v161_v19 }
  0x31   : > { %371 = vmatmul.msk.f32.gmra.mxu0 %vm173_vm0, %v149_v20  ;;  %375 = vmatmul.msk.f32.gmra.mxu1 %vm173_vm0, %v153_v21 }
  0x37   : > { %380 = vmatmul.msk.f32.gmra.mxu2 %vm173_vm0, %v158_v22  ;;  %384 = vmatmul.msk.f32.gmra.mxu3 %vm173_vm0, %v162_v23 }
  0x39   : > { %372 = vmatmul.msk.f32.gmra.mxu0 %vm173_vm0, %v150_v24  ;;  %376 = vmatmul.msk.f32.gmra.mxu1 %vm173_vm0, %v154_v25 }
  0x9e   : > { %v239_v26 = vpop.f32.mrf.mxu0  ;;  %v251_v27 = vpop.f32.mrf.mxu1 }
  0x9f   : > { %288 = vst.msk [vmem:[%s533_s11] sm:$0xff] %vm287_vm1, %v239_v26 }
  0xa0   : > { %292 = vst.msk [vmem:[%s533_s11 + $0x20] sm:$0xff] %vm287_vm1, %v251_v27 }
  0xa2   : > { %v263_v28 = vpop.f32.mrf.mxu2  ;;  %v275_v29 = vpop.f32.mrf.mxu3 }
  0xa3   : > { %296 = vst.msk [vmem:[%s533_s11 + $0x40] sm:$0xff] %vm287_vm1, %v263_v28 }
  0xa4   : > { %300 = vst.msk [vmem:[%s533_s11 + $0x60] sm:$0xff] %vm287_vm1, %v275_v29 }
  0xa6   : > { %v242_v30 = vpop.f32.mrf.mxu0  ;;  %v254_v31 = vpop.f32.mrf.mxu1 }
  0xa7   : > { %289 = vst.msk [vmem:[%s533_s11 + $0x8] sm:$0xff] %vm287_vm1, %v242_v30 }
  0xa8   : > { %293 = vst.msk [vmem:[%s533_s11 + $0x28] sm:$0xff] %vm287_vm1, %v254_v31 }
  0xaa   : > { %v266_v32 = vpop.f32.mrf.mxu2  ;;  %v278_v33 = vpop.f32.mrf.mxu3 }
  0xab   : > { %297 = vst.msk [vmem:[%s533_s11 + $0x48] sm:$0xff] %vm287_vm1, %v266_v32 }
  0xac   : > { %301 = vst.msk [vmem:[%s533_s11 + $0x68] sm:$0xff] %vm287_vm1, %v278_v33 }
  0xae   : > { %v245_v34 = vpop.f32.mrf.mxu0  ;;  %v257_v35 = vpop.f32.mrf.mxu1 }
  0xaf   : > { %290 = vst.msk [vmem:[%s533_s11 + $0x10] sm:$0xff] %vm287_vm1, %v245_v34 }
  0xb0   : > { %294 = vst.msk [vmem:[%s533_s11 + $0x30] sm:$0xff] %vm287_vm1, %v257_v35 }
  0xb2   : > { %v269_v36 = vpop.f32.mrf.mxu2  ;;  %v281_v37 = vpop.f32.mrf.mxu3 }
  0xb3   : > { %298 = vst.msk [vmem:[%s533_s11 + $0x50] sm:$0xff] %vm287_vm1, %v269_v36 }
  0xb4   : > { %302 = vst.msk [vmem:[%s533_s11 + $0x70] sm:$0xff] %vm287_vm1, %v281_v37 }
  0xb6   : > { %v248_v38 = vpop.f32.mrf.mxu0  ;;  %v260_v39 = vpop.f32.mrf.mxu1 }
  0xb7   : > { %291 = vst.msk [vmem:[%s533_s11 + $0x18] sm:$0xff] %vm287_vm1, %v248_v38 }
  0xb8   : > { %295 = vst.msk [vmem:[%s533_s11 + $0x38] sm:$0xff] %vm287_vm1, %v260_v39 }
  0xba   : > { %v272_v40 = vpop.f32.mrf.mxu2  ;;  %v284_v41 = vpop.f32.mrf.mxu3 }
  0xbb   : > { %299 = vst.msk [vmem:[%s533_s11 + $0x58] sm:$0xff] %vm287_vm1, %v272_v40 }
  0xbc   : > { %303 = vst.msk [vmem:[%s533_s11 + $0x78] sm:$0xff] %vm287_vm1, %v284_v41 }
  0xbd PF: > { %s12_s9 = sadd.s32 1, %s431_s9  }
  0xbe   : > { %p9_p4 = scmp.ge.s32.totalorder %s12_s9, 6  }
  0xc0   :  { %11 = sbr.rel (!%p9_p4) target bundleno = 1 (0x1), region = 58 }

</bundles_post_ra>
